<compile_context>
chip_gen: v7x
topology: tpu7x:2x2x1
jax: 0.10.0
libtpu: 0.0.40
codegen_flags: <defaults>
</compile_context>

<pallas_src>
import jax
import jax.numpy as jnp
from jax.experimental import pallas as pl
from jax.experimental.pallas import tpu as pltpu


def ann_kernel(mT_ref, w1T_ref, b1_ref, w2T_ref, b2_ref, out_ref):
    """fc1 -> relu -> (dropout = identity, eval) -> fc2 -> sigmoid, transposed.

    mT_ref : (E, TB)  bf16   mean-pooled embeddings, batch on the lane axis
    w1T_ref: (H_pad, E) bf16 fc1 weight, pre-transposed & zero-padded to 128
    b1_ref : (H_pad, 1) f32  fc1 bias column
    w2T_ref: (F, H_pad) f32  fc2 weight, pre-transposed & zero-padded
    b2_ref : (1,) f32 SMEM   fc2 bias scalar (F == 1)
    out_ref: (F, TB) f32
    """
    # fc1: bf16 x bf16 on the MXU, f32 accumulation.
    h = jnp.dot(w1T_ref[...], mT_ref[...], preferred_element_type=jnp.float32)
    h = jnp.maximum(h + b1_ref[...], 0.0)                       # (H_pad, TB) f32
    # TODO(synk): nn.Dropout is identity at inference; training-mode masking
    # (pltpu.prng_seed / prng_random_bits) is not implemented.
    # fc2 is a (1, H_pad) @ (H_pad, TB) matvec — MXU has huge slack here, the
    # kernel is memory-bound, so the MXU round trip is left as-is (low prio).
    o = jnp.dot(w2T_ref[...], h, preferred_element_type=jnp.float32) + b2_ref[0]
    out_ref[...] = jax.nn.sigmoid(o)                            # (F, TB) f32


def ann_forward(token_ids, emb_table, w1, b1, w2, b2, *, block_b=8192):
    """token_ids: (B, S) int32; emb_table: (V, E); w1: (E, H); w2: (H, F)."""
    B, S = token_ids.shape
    V, E = emb_table.shape
    H = w1.shape[1]
    F = w2.shape[1]
    # The module fixes final_layer_neurons=1; the SMEM-scalar b2 path relies on it.
    assert F == 1, "kernel assumes final_layer_neurons == 1 (module default)"
    assert block_b % 128 == 0, "block_b must be a multiple of 128"

    # --- trace-time weight prep -------------------------------------------
    # Pad hidden 100 -> 128 with zeros (relu(0)=0 and zero w2 rows contribute 0).
    H_pad = ((H + 127) // 128) * 128
    w1p = jnp.zeros((E, H_pad), jnp.float32).at[:, :H].set(w1.astype(jnp.float32))
    b1p = jnp.zeros((H_pad,), jnp.float32).at[:H].set(b1.astype(jnp.float32))
    w2p = jnp.zeros((H_pad, F), jnp.float32).at[:H, :].set(w2.astype(jnp.float32))

    w1T = w1p.T.astype(jnp.bfloat16)             # (H_pad, E) bf16 for the MXU
    b1c = b1p.reshape(H_pad, 1)                  # (H_pad, 1) f32 (bias add in f32)
    w2T = w2p.T                                  # (F, H_pad) f32 (tiny; matches f32 h)
    b2s = b2.astype(jnp.float32).reshape(F)      # (1,) -> SMEM scalar

    # --- fused gather + mean in the wrapper, emitted directly in (E, B) -----
    # Gather columns of emb_table.T and reduce over the trailing seq axis so no
    # separate (B,E)->(E,B) transpose of the big slab is materialized in HBM.
    # padding_idx=0 is handled by a zeroed row 0 in emb_table (assumed, not
    # enforced); torch.mean divides by S including padding tokens, matching the
    # reference module.
    mT = jnp.mean(
        jnp.take(emb_table.T.astype(jnp.float32), token_ids, axis=1),  # (E, B, S)
        axis=-1,
    ).astype(jnp.bfloat16)                                             # (E, B) bf16

    # --- batch tiling (always lane-dense: pad B to a multiple of 128) -------
    B_pad128 = ((B + 127) // 128) * 128
    if B_pad128 <= block_b:
        TB, B_pad = B_pad128, B_pad128           # single full block
    else:
        TB = block_b                             # multiple of 128; >= 2 grid steps
        B_pad = ((B + TB - 1) // TB) * TB
    if B_pad != B:
        mT = jnp.pad(mT, ((0, 0), (0, B_pad - B)))

    grid = (B_pad // TB,)

    outT = pl.pallas_call(
        ann_kernel,
        out_shape=jax.ShapeDtypeStruct((F, B_pad), jnp.float32),
        grid=grid,
        in_specs=[
            pl.BlockSpec((E, TB), lambda i: (0, i)),        # activations: tiled over batch
            pl.BlockSpec((H_pad, E), lambda i: (0, 0)),     # fc1 weight: VMEM-resident
            pl.BlockSpec((H_pad, 1), lambda i: (0, 0)),     # fc1 bias:   VMEM-resident
            pl.BlockSpec((F, H_pad), lambda i: (0, 0)),     # fc2 weight: VMEM-resident
            pl.BlockSpec(memory_space=pltpu.MemorySpace.SMEM),  # fc2 bias scalar
        ],
        out_specs=pl.BlockSpec((F, TB), lambda i: (0, i)),  # lane-dense (F, B) output
        compiler_params=pltpu.CompilerParams(
            # Batch axis is embarrassingly parallel: shards across TCs on v7x,
            # measured no-op on v5e/v6e. VMEM use at TB=8192 (~5 MB incl. the
            # f32 h intermediate) stays well under the default scoped limit on
            # every generation; set vmem_limit_bytes only if block_b >> 32768.
            dimension_semantics=("parallel",),
        ),
    )(mT, w1T, b1c, w2T, b2s)

    return outT[:, :B].T                                    # (B, F) f32


if __name__ == "__main__":
    key = jax.random.PRNGKey(0)
    k_emb, k_tok, k_w1, k_b1, k_w2, k_b2 = jax.random.split(key, 6)

    # Small shapes consistent with the module.
    vocab_size = 50
    embedding_size = 32
    batch = 8
    seq = 8
    hidden = 100
    final_layer_neurons = 1

    # Deterministic "pretrained" embedding table; row 0 is the padding row
    # (zeros), mimicking nn.Embedding(padding_idx=0).
    emb_table = jax.random.normal(k_emb, (vocab_size, embedding_size), dtype=jnp.float32)
    emb_table = emb_table.at[0].set(0.0)

    # fc1 / fc2 parameters (PyTorch Linear computes x @ W.T + b; weights here
    # are stored already transposed as (in, out)).
    w1 = jax.random.normal(k_w1, (embedding_size, hidden), dtype=jnp.float32) * 0.1
    b1 = jax.random.normal(k_b1, (hidden,), dtype=jnp.float32) * 0.1
    w2 = jax.random.normal(k_w2, (hidden, final_layer_neurons), dtype=jnp.float32) * 0.1
    b2 = jax.random.normal(k_b2, (final_layer_neurons,), dtype=jnp.float32) * 0.1

    token_ids = jax.random.randint(k_tok, (batch, seq), 0, vocab_size, dtype=jnp.int32)

    out = ann_forward(token_ids, emb_table, w1, b1, w2, b2)
    out = jax.block_until_ready(out)

    # Pure-JAX f32 reference check (unpadded weights). Tolerance loosened for
    # the bf16 activation/weight path (f32 accumulation on the MXU).
    x_ref = jnp.take(emb_table, token_ids, axis=0)
    m_ref = jnp.mean(x_ref, axis=1)
    h_ref = jnp.maximum(m_ref @ w1 + b1, 0.0)
    o_ref = jax.nn.sigmoid(h_ref @ w2 + b2)
    assert out.shape == (batch, final_layer_neurons)
    assert jnp.allclose(out, o_ref, atol=2e-2, rtol=2e-2)

    print("KERNEL_OK")
</pallas_src>

<mosaic_0001>
module attributes {stable_mosaic.version = 11 : i64} {
  func.func @ann_kernel(%arg0: i32, %arg1: memref<32x128xbf16, #tpu.memory_space<vmem>>, %arg2: memref<128x32xbf16, #tpu.memory_space<vmem>>, %arg3: memref<128x1xf32, #tpu.memory_space<vmem>>, %arg4: memref<1x128xf32, #tpu.memory_space<vmem>>, %arg5: memref<1xf32, #tpu.memory_space<smem>>, %arg6: memref<1x128xf32, #tpu.memory_space<vmem>>) attributes {dimension_semantics = [#tpu.dimension_semantics<parallel>], iteration_bounds = array<i64: 1>, scalar_prefetch = 0 : i64, scratch_operands = 0 : i64, tpu.core_type = #tpu.core_type<tc>, window_params = [{transform_indices = @transform_0, window_bounds = array<i64: 32, 128>}, {pipeline_mode = #tpu.pipeline_mode<synchronous>, transform_indices = @transform_1, window_bounds = array<i64: 128, 32>}, {pipeline_mode = #tpu.pipeline_mode<synchronous>, transform_indices = @transform_2, window_bounds = array<i64: 128, 1>}, {pipeline_mode = #tpu.pipeline_mode<synchronous>, transform_indices = @transform_3, window_bounds = array<i64: 1, 128>}, {transform_indices = @transform_4, window_bounds = array<i64: 1>}, {transform_indices = @transform_5, window_bounds = array<i64: 1, 128>}]} {
    %c0 = arith.constant 0 : index
    %c0_0 = arith.constant 0 : index
    %0 = vector.load %arg2[%c0, %c0_0] : memref<128x32xbf16, #tpu.memory_space<vmem>>, vector<128x32xbf16>
    %c0_1 = arith.constant 0 : index
    %c0_2 = arith.constant 0 : index
    %1 = vector.load %arg1[%c0_1, %c0_2] : memref<32x128xbf16, #tpu.memory_space<vmem>>, vector<32x128xbf16>
    %cst = arith.constant dense<0.000000e+00> : vector<128x128xf32>
    %2 = tpu.matmul %0, %1, %cst {dimension_numbers = #tpu.dot_dimension_numbers<[1], [0], [0], [1], [0, 0, 1, 1], [], []>} : vector<128x32xbf16>, vector<32x128xbf16>, vector<128x128xf32> -> vector<128x128xf32>
    %c0_3 = arith.constant 0 : index
    %c0_4 = arith.constant 0 : index
    %3 = vector.load %arg3[%c0_3, %c0_4] : memref<128x1xf32, #tpu.memory_space<vmem>>, vector<128x1xf32>
    %4 = vector.broadcast %3 : vector<128x1xf32> to vector<128x128xf32>
    %5 = arith.addf %2, %4 : vector<128x128xf32>
    %cst_5 = arith.constant 0.000000e+00 : f32
    %6 = vector.broadcast %cst_5 : f32 to vector<128x128xf32>
    %7 = arith.maximumf %5, %6 : vector<128x128xf32>
    %c0_6 = arith.constant 0 : index
    %c0_7 = arith.constant 0 : index
    %8 = vector.load %arg4[%c0_6, %c0_7] : memref<1x128xf32, #tpu.memory_space<vmem>>, vector<1x128xf32>
    %cst_8 = arith.constant dense<0.000000e+00> : vector<1x128xf32>
    %9 = tpu.matmul %8, %7, %cst_8 {dimension_numbers = #tpu.dot_dimension_numbers<[1], [0], [0], [1], [0, 0, 1, 1], [], []>} : vector<1x128xf32>, vector<128x128xf32>, vector<1x128xf32> -> vector<1x128xf32>
    %c0_9 = arith.constant 0 : index
    %10 = memref.load %arg5[%c0_9] : memref<1xf32, #tpu.memory_space<smem>>
    %11 = vector.broadcast %10 : f32 to vector<1x128xf32>
    %12 = arith.addf %9, %11 : vector<1x128xf32>
    %13 = arith.negf %12 : vector<1x128xf32>
    %14 = math.exp %13 : vector<1x128xf32>
    %cst_10 = arith.constant 1.000000e+00 : f32
    %15 = vector.broadcast %cst_10 : f32 to vector<1x128xf32>
    %16 = arith.addf %15, %14 : vector<1x128xf32>
    %17 = arith.divf %15, %16 : vector<1x128xf32>
    %c0_11 = arith.constant 0 : index
    %c0_12 = arith.constant 0 : index
    %18 = vector.load %arg6[%c0_11, %c0_12] : memref<1x128xf32, #tpu.memory_space<vmem>>, vector<1x128xf32>
    tpu.vector_store %arg6[%c0_11, %c0_12], %17 {strides = array<i32>} : memref<1x128xf32, #tpu.memory_space<vmem>>, vector<1x128xf32>,
    return
  }
  func.func @transform_0(%arg0: i32) -> (i32, i32) {
    %c0_i32 = arith.constant 0 : i32
    %c0_i32_0 = arith.constant 0 : i32
    return %c0_i32, %arg0 : i32, i32
  }
  func.func @transform_1(%arg0: i32) -> (i32, i32) {
    %c0_i32 = arith.constant 0 : i32
    %c0_i32_0 = arith.constant 0 : i32
    %c0_i32_1 = arith.constant 0 : i32
    return %c0_i32, %c0_i32_0 : i32, i32
  }
  func.func @transform_2(%arg0: i32) -> (i32, i32) {
    %c0_i32 = arith.constant 0 : i32
    %c0_i32_0 = arith.constant 0 : i32
    %c0_i32_1 = arith.constant 0 : i32
    return %c0_i32, %c0_i32_0 : i32, i32
  }
  func.func @transform_3(%arg0: i32) -> (i32, i32) {
    %c0_i32 = arith.constant 0 : i32
    %c0_i32_0 = arith.constant 0 : i32
    %c0_i32_1 = arith.constant 0 : i32
    return %c0_i32, %c0_i32_0 : i32, i32
  }
  func.func @transform_4(%arg0: i32) -> i32 {
    %c0_i32 = arith.constant 0 : i32
    %c0_i32_0 = arith.constant 0 : i32
    return %c0_i32 : i32
  }
  func.func @transform_5(%arg0: i32) -> (i32, i32) {
    %c0_i32 = arith.constant 0 : i32
    %c0_i32_0 = arith.constant 0 : i32
    return %c0_i32, %arg0 : i32, i32
  }
}

</mosaic_0001>

<bundles_post_ra>
// kernel: tpu_custom_call.1
= control target key start
LH: loop header
LB: loop body
LE: loop exit
PB: predicated region body
PF: predicated region fallthrough
CT: control target
= control target key end

     0   :  { %vm191_vm0 = vcmask 261120   ;;  %v593_v3 = vmov 0   ;;  %s740_s0 = inlined_call_operand.vmem [shape: bf16[32,128], index: 0, kind: input, shape index: {}]   ;;  %s741_s1 = inlined_call_operand.vmem [shape: bf16[128,32], index: 1, kind: input, shape index: {}]   ;;  %s742_s2 = inlined_call_operand.vmem [shape: f32[128,1], index: 2, kind: input, shape index: {}]   ;;  %s743_s3 = inlined_call_operand.vmem [shape: f32[1,128], index: 3, kind: input, shape index: {}]   ;;  %s744_s4 = inlined_call_operand.<no memory space> [shape: f32[1], index: 4, kind: input, shape index: {}]   ;;  %s745_s5 = inlined_call_operand.hbm [shape: f32[1,128], index: 5, kind: output, shape index: {}]  }
   0x1   :  { %v555_v0 = vld [vmem:[%s740_s0] sm:$0xff]   ;;  %v556_v1 = vld [vmem:[%s740_s0 + $0x8] sm:$0xff]   ;;  %553 = vset.pattern.permute.xlu0 %v593_v3  ;;  %554 = vset.pattern.permute.xlu1 %v593_v3  ;;  %v559_v5 = vld [vmem:[%s741_s1 + $0x10] sm:$0xff]  }
   0x2   :  { %469 = vmatprep.subr.bf16.mxu0 %v555_v0  ;;  %v557_v2 = vld [vmem:[%s741_s1] sm:$0xff]   ;;  %v558_v4 = vld [vmem:[%s741_s1 + $0x8] sm:$0xff]   ;;  %v45_v7 = vld [vmem:[%s742_s2 + $0x10] sm:$0xff] }
   0x3   :  { %470 = vmatpush3.bf16.msra.mxu0 %v555_v0  ;;  %473 = vmatprep.mubr.msk.bf16.mxu0 %vm191_vm0, %v557_v2  ;;  %v43_v6 = vld [vmem:[%s742_s2] sm:$0xff]  ;;  %v44_v8 = vld [vmem:[%s742_s2 + $0x8] sm:$0xff]  ;;  %v46_v9 = vld [vmem:[%s742_s2 + $0x18] sm:$0xff] }
   0x4   :  { %471 = vmatprep.subr.bf16.mxu0 %v556_v1  ;;  %61 = vperm.xlu0 %553, %v43_v6   ;;  %v560_v10 = vld [vmem:[%s741_s1 + $0x18] sm:$0xff]   ;;  %v561_v11 = vld [vmem:[%s741_s1 + $0x20] sm:$0xff]  }
   0x5   :  { %71 = vperm.xlu1 %554, %v45_v7  }
   0x7   :  { %472 = vmatpush3.bf16.msra.mxu0 %v556_v1 }
   0x8   :  { %66 = vperm.xlu0 %553, %v44_v8  }
   0xa   :  { %474 = vmatmul.mubr.msk.bf16.vlgmr.msra.gmra.mrb[0].mxu0 %vm191_vm0, %v558_v4 }
   0xb   :  { %477 = vmatprep.mubr.msk.bf16.mxu0 %vm191_vm0, %v559_v5 }
   0xc   :  { %11 = vsyncpa [#allocation4], 0  ;;  %76 = vperm.xlu1 %554, %v46_v9   ;;  %v47_v12 = vld [vmem:[%s742_s2 + $0x20] sm:$0xff]  ;;  %v48_v13 = vld [vmem:[%s742_s2 + $0x28] sm:$0xff]  ;;  %v594_v27 = vmov 0.0|0.0   ;;  %vm595_vm1 = vmmov 0  }
   0xd   :  { %81 = vperm.xlu0 %553, %v47_v12   ;;  %v49_v14 = vld [vmem:[%s742_s2 + $0x30] sm:$0xff]  ;;  %v50_v15 = vld [vmem:[%s742_s2 + $0x38] sm:$0xff]  ;;  %v562_v16 = vld [vmem:[%s741_s1 + $0x28] sm:$0xff]   ;;  %524 = vmatprep.subr.bf16.mxu1 %v594_v27  ;;  %v596_v28 = vmov 0.0   ;;  %s597_s20 = smov [#allocation3]  }
   0xe   :  { %v563_v17 = vld [vmem:[%s741_s1 + $0x30] sm:$0xff]   ;;  %v51_v18 = vld [vmem:[%s742_s2 + $0x40] sm:$0xff]  ;;  %v52_v19 = vld [vmem:[%s742_s2 + $0x48] sm:$0xff]  ;;  %521 = vmatprep.mubr.msk.f32.mxu1 %vm595_vm1, %v596_v28  ;;  %s415_s21 = sshll.u32 %s597_s20, 4  ;;  %s416_s21 = int_to_ptr.vmem [resolvable:$true] %s415_s21 }
   0xf   :  { %v53_v20 = vld [vmem:[%s742_s2 + $0x50] sm:$0xff]  ;;  %v54_v21 = vld [vmem:[%s742_s2 + $0x58] sm:$0xff]  ;;  %v55_v23 = vld [vmem:[%s742_s2 + $0x60] sm:$0xff]  ;;  %s569_s22 = scalar_lea.vmem %s416_s21, 16  ;;  %p574_p1 = scmp.lt.s32.totalorder %s416_s21, %s416_s21 }
  0x10   :  { %86 = vperm.xlu1 %554, %v48_v13   ;;  %v564_v22 = vld [vmem:[%s741_s1 + $0x38] sm:$0xff]   ;;  %v56_v24 = vld [vmem:[%s742_s2 + $0x68] sm:$0xff]  ;;  %v57_v25 = vld [vmem:[%s742_s2 + $0x70] sm:$0xff]  ;;  %p570_p0 = scmp.ne.s32.totalorder %s416_s21, %s569_s22 }
  0x11   :  { %91 = vperm.xlu0 %553, %v49_v14   ;;  %v58_v26 = vld [vmem:[%s742_s2 + $0x78] sm:$0xff] }
  0x12   :  { %478 = vmatmul.mubr.msk.bf16.gmra.mrb[4].mxu0 %vm191_vm0, %v560_v10 }
  0x13   :  { %481 = vmatprep.mubr.msk.bf16.mxu0 %vm191_vm0, %v561_v11 }
  0x14   :  { %96 = vperm.xlu1 %554, %v50_v15  }
  0x15   :  { %101 = vperm.xlu0 %553, %v51_v18  }
  0x18   :  { %106 = vperm.xlu1 %554, %v52_v19  }
  0x19   :  { %111 = vperm.xlu0 %553, %v53_v20  }
  0x1a   :  { %482 = vmatmul.mubr.msk.bf16.gmra.mrb[8].mxu0 %vm191_vm0, %v562_v16 }
  0x1b   :  { %485 = vmatprep.mubr.msk.bf16.mxu0 %vm191_vm0, %v563_v17 }
  0x1c   :  { %116 = vperm.xlu1 %554, %v54_v21  }
  0x1d   :  { %121 = vperm.xlu0 %553, %v55_v23  }
  0x20   :  { %126 = vperm.xlu1 %554, %v56_v24  }
  0x21   :  { %131 = vperm.xlu0 %553, %v57_v25  }
  0x22   :  { %486 = vmatmul.mubr.msk.bf16.gmra.mrb[12].mxu0 %vm191_vm0, %v564_v22 }
  0x24   :  { %136 = vperm.xlu1 %554, %v58_v26  }
  0x83   :  { %v62_v29 = vpop.permute.xlu0 %61 }
  0x84   :  { %v72_v30 = vpop.permute.xlu1 %71 }
  0x87   :  { %v67_v31 = vpop.permute.xlu0 %66 }
  0x8b   :  { %v77_v32 = vpop.permute.xlu1 %76 }
  0x8c   :  { %v82_v33 = vpop.permute.xlu0 %81 }
  0x8f   :  { %v87_v34 = vpop.permute.xlu1 %86 }
  0x90   :  { %v92_v35 = vpop.permute.xlu0 %91 }
  0x93   :  { %v97_v39 = vpop.permute.xlu1 %96 }
  0x94   :  { %v102_v47 = vpop.permute.xlu0 %101 }
  0x97   :  { %v107_v51 = vpop.permute.xlu1 %106 }
  0x98   :  { %v112_v60 = vpop.permute.xlu0 %111 }
  0x9b   :  { %v117_v0 = vpop.permute.xlu1 %116 }
  0x9c   :  { %v122_v8 = vpop.permute.xlu0 %121 }
  0x9f   :  { %v127_v13 = vpop.permute.xlu1 %126 }
  0xa0   :  { %v132_v20 = vpop.permute.xlu0 %131 }
  0xa3   :  { %v137_v25 = vpop.permute.xlu1 %136 }
  0xdd   :  { %v475_v36 = vpop.f32.mrb[0].mxu0 }
  0xde   :  { %v259_v37 = vadd.f32 %v475_v36, %v72_v30  ;;  %v250_v38 = vpop.f32.mrb[1].mxu0 }
  0xdf   :  { %v251_v40 = vadd.f32 %v250_v38, %v62_v29  ;;  %v476_v41 = vpop.f32.mrb[2].mxu0  ;;  %v329_v38 = vld [vmem:[%s743_s3] sm:$0x1]  ;;  %s573_s3 = scalar_lea.vmem %s416_s21, 32 }
  0xe0   :  { %v262_v42 = vadd.f32 %v476_v41, %v77_v32  ;;  %v253_v43 = vpop.f32.mrb[3].mxu0  ;;  %v315_v45 = vmax.f32 %v259_v37, 0.0  ;;  %p575_p2 = scmp.lt.s32.totalorder %s573_s3, %s569_s22 }
  0xe1   :  { %v254_v44 = vadd.f32 %v253_v43, %v67_v31  ;;  %v313_v48 = vmax.f32 %v251_v40, 0.0 }
  0xe2   :  { %v316_v46 = vmax.f32 %v262_v42, 0.0  ;;  %p576_p3 = por %p575_p2, %p574_p1 }
  0xe3   :  { %v314_v49 = vmax.f32 %v254_v44, 0.0 }
  0xe4   :  { %v528_v50 = vpack.c.bf16 %v316_v46, %v315_v45  ;;  %p577_p4 = pnand %p576_p3, %p570_p0 }
  0xe5   :  { %v479_v52 = vpop.f32.mrb[4].mxu0  ;;  %v525_v53 = vpack.c.bf16 %v314_v49, %v313_v48 }
  0xe6   :  { %v275_v54 = vadd.f32 %v479_v52, %v92_v35  ;;  %v266_v55 = vpop.f32.mrb[5].mxu0 }
  0xe7   :  { %v267_v56 = vadd.f32 %v266_v55, %v82_v33  ;;  %v480_v57 = vpop.f32.mrb[6].mxu0  ;;  %526 = vmatpush3.bf16.msra.mxu1 %v525_v53 }
  0xe8   :  { %v278_v58 = vadd.f32 %v480_v57, %v97_v39  ;;  %v269_v59 = vpop.f32.mrb[7].mxu0  ;;  %527 = vmatprep.subr.bf16.mxu1 %v594_v27  ;;  %v319_v62 = vmax.f32 %v275_v54, 0.0  ;;  %v331_v39 = vstv %s744_s4 }
  0xe9   :  { %v270_v61 = vadd.f32 %v269_v59, %v87_v34  ;;  %v317_v1 = vmax.f32 %v267_v56, 0.0 }
  0xea   :  { %v320_v63 = vmax.f32 %v278_v58, 0.0 }
  0xeb   :  { %v318_v2 = vmax.f32 %v270_v61, 0.0  ;;  %529 = vmatpush3.bf16.msra.mxu1 %v528_v50 }
  0xec   :  { %v534_v3 = vpack.c.bf16 %v320_v63, %v319_v62  ;;  %530 = vmatprep.subr.bf16.mxu1 %v594_v27 }
  0xed   :  { %v531_v4 = vpack.c.bf16 %v318_v2, %v317_v1  ;;  %v483_v5 = vpop.f32.mrb[8].mxu0 }
  0xee   :  { %v291_v6 = vadd.f32 %v483_v5, %v112_v60  ;;  %v282_v7 = vpop.f32.mrb[9].mxu0 }
  0xef   :  { %v283_v9 = vadd.f32 %v282_v7, %v102_v47  ;;  %v484_v10 = vpop.f32.mrb[10].mxu0  ;;  %532 = vmatpush3.bf16.msra.mxu1 %v531_v4 }
  0xf0   :  { %v294_v11 = vadd.f32 %v484_v10, %v117_v0  ;;  %v285_v12 = vpop.f32.mrb[11].mxu0  ;;  %533 = vmatprep.subr.bf16.mxu1 %v594_v27  ;;  %v323_v15 = vmax.f32 %v291_v6, 0.0 }
  0xf1   :  { %v286_v14 = vadd.f32 %v285_v12, %v107_v51  ;;  %v321_v17 = vmax.f32 %v283_v9, 0.0 }
  0xf2   :  { %v324_v16 = vmax.f32 %v294_v11, 0.0 }
  0xf3   :  { %v322_v18 = vmax.f32 %v286_v14, 0.0  ;;  %535 = vmatpush3.bf16.msra.mxu1 %v534_v3 }
  0xf4   :  { %v540_v19 = vpack.c.bf16 %v324_v16, %v323_v15  ;;  %536 = vmatprep.subr.bf16.mxu1 %v594_v27 }
  0xf5   :  { %v537_v21 = vpack.c.bf16 %v322_v18, %v321_v17  ;;  %v487_v22 = vpop.f32.mrb[12].mxu0 }
  0xf6   :  { %v307_v23 = vadd.f32 %v487_v22, %v132_v20  ;;  %v298_v24 = vpop.f32.mrb[13].mxu0 }
  0xf7   :  { %v299_v26 = vadd.f32 %v298_v24, %v122_v8  ;;  %v488_v28 = vpop.f32.mrb[14].mxu0  ;;  %538 = vmatpush3.bf16.msra.mxu1 %v537_v21 }
  0xf8   :  { %v310_v29 = vadd.f32 %v488_v28, %v137_v25  ;;  %v301_v30 = vpop.f32.mrb[15].mxu0  ;;  %539 = vmatprep.subr.bf16.mxu1 %v594_v27  ;;  %v327_v32 = vmax.f32 %v307_v23, 0.0 }
  0xf9   :  { %v302_v31 = vadd.f32 %v301_v30, %v127_v13  ;;  %v325_v34 = vmax.f32 %v299_v26, 0.0 }
  0xfa   :  { %v328_v33 = vmax.f32 %v310_v29, 0.0 }
  0xfb   :  { %v326_v35 = vmax.f32 %v302_v31, 0.0  ;;  %541 = vmatpush3.bf16.msra.mxu1 %v540_v19 }
  0xfc   :  { %v546_v36 = vpack.c.bf16 %v328_v33, %v327_v32  ;;  %542 = vmatprep.subr.bf16.mxu1 %v594_v27 }
  0xfd   :  { %v543_v37 = vpack.c.bf16 %v326_v35, %v325_v34 }
  0xff   :  { %544 = vmatpush3.bf16.msra.mxu1 %v543_v37 }
 0x100   :  { %545 = vmatprep.subr.bf16.mxu1 %v594_v27 }
 0x103   :  { %547 = vmatpush3.bf16.msra.mxu1 %v546_v36 }
 0x106   :  { %522 = vmatmul.mubr.f32.vlgmr.msra.gmra.mrb[0].mxu1 %v329_v38 }
 0x1d9   :  { %v398_v40 = vpop.f32.mrb[0].mxu1 }
 0x1da   :  { %v399_v41 = vadd.f32 %v398_v40, %v331_v39  ;;  %v523_v42 = vpop.f32.mrb[1].mxu1 }
 0x1dc   :  { %v441_v43 = vmul.f32 -1.442695, %v399_v41 }
 0x1de   :  { %565 = vpow2.f32 %v441_v43 }
 0x1e8   :  { %v566_v44 = vpop.eup %565 }
 0x1e9   :  { %v405_v45 = vadd.f32 1.0, %v566_v44 }
 0x1eb   :  { %567 = vrcp.f32 %v405_v45 }
 0x1f5   :  { %v568_v27 = vpop.eup %567 }
 0x1f6   :  { %408 = vst [vmem:[#allocation3] sm:$0x1] %v568_v27 }
 0x1f7   :  { %580 = shalt.err (!%p577_p4)
}
 0x1f8   :  { %s581_s24 = scalar_lea.hbm %s745_s5, 16 }
 0x1f9   :  { %p582_p5 = scmp.ne.s32.totalorder %s745_s5, %s581_s24  ;;  %p585_p6 = scmp.lt.u32.totalorder %s581_s24, %s745_s5 }
 0x1fb   :  { %p587_p7 = pnand %p585_p6, %p582_p5 }
 0x1fd   :  { %590 = shalt.err (!%p587_p7)
}
 0x1fe   :  { %418 = dma.vmem_to_hbm [thread:$0]  %s416_s21, 16, %s745_s5, [#allocation4]  }
 0x1ff   :  { %591 = dma.done.wait [#allocation4], 16  }
 0x200   :  { %592 = vsyncadd [#allocation4], 4294967280 }
 0x201   :  { %422 = vsyncpa [#allocation4], 1 }

</bundles_post_ra>
